<compile_context>
chip_gen: v5e
topology: v5e:2x2
jax: 0.10.0
libtpu: 0.0.40
codegen_flags: <defaults>
</compile_context>

<pallas_src>
import math
import numpy as np
import jax
import jax.numpy as jnp
from jax.experimental import pallas as pl
from jax.experimental.pallas import tpu as pltpu

# ---- model dims (small synthetic config) ----
B, S, D = 2, 8, 32
NUM_HEADS, NUM_KV_HEADS, HEAD_DIM = 4, 2, 8
MLP_HIDDEN = 64
EPS = 1e-6
ROPE_BASE = 10000.0
N_TOK = B * S  # flattened token rows


def _rms_norm(v, w):
    ms = jnp.mean(v * v, axis=-1, keepdims=True)
    return v * jax.lax.rsqrt(ms + EPS) * w


def decoder_layer_kernel(x_ref, sa_w_ref, mlp_w_ref,
                         wq_ref, wqr_ref, wk_ref, wkr_ref, wv_ref, wo_ref,
                         w1_ref, w3_ref, w2_ref,
                         cos_ref, sin_ref, bias_ref, out_ref):
    x = x_ref[...]                          # [N, D]   (N = B*S)
    cos = cos_ref[...][None]                # [1, N, hd]
    sin = sin_ref[...][None]                # [1, N, hd]

    # ---------- self-attention branch ----------
    xn = _rms_norm(x, sa_w_ref[...])                                   # [N, D]
    xn_b = jnp.broadcast_to(xn[None], (NUM_HEADS, N_TOK, D))           # [H, N, D]

    # per-head projections (scale, GQA replication and rotate-half already
    # folded into the weight stacks by the wrapper)
    q = jnp.einsum('hnd,hdf->hnf', xn_b, wq_ref[...],
                   preferred_element_type=jnp.float32)                 # [H, N, hd]
    qr = jnp.einsum('hnd,hdf->hnf', xn_b, wqr_ref[...],
                    preferred_element_type=jnp.float32)
    k = jnp.einsum('hnd,hdf->hnf', xn_b, wk_ref[...],
                   preferred_element_type=jnp.float32)
    kr = jnp.einsum('hnd,hdf->hnf', xn_b, wkr_ref[...],
                    preferred_element_type=jnp.float32)
    v = jnp.einsum('hnd,hdf->hnf', xn_b, wv_ref[...],
                   preferred_element_type=jnp.float32)

    # RoPE: rope(t) = t*cos + rot(t)*sin; rot is folded into the qr/kr weights
    q_rope = q * cos + qr * sin                                        # [H, N, hd]
    k_rope = k * cos + kr * sin

    # scores over the flattened token axis; block-diagonal causal bias keeps
    # attention inside each batch sample and causal within it
    s = jnp.einsum('hqf,hkf->hqk', q_rope, k_rope,
                   preferred_element_type=jnp.float32)                 # [H, N, N]
    s = s + bias_ref[...][None]

    m = jnp.max(s, axis=-1, keepdims=True)
    p = jnp.exp(s - m)
    denom = jnp.sum(p, axis=-1, keepdims=True)
    p = p * pl.reciprocal(denom, approx=True)

    o = jnp.einsum('hqk,hkf->hqf', p, v,
                   preferred_element_type=jnp.float32)                 # [H, N, hd]
    attn = jnp.einsum('hnf,hfd->hnd', o, wo_ref[...],
                      preferred_element_type=jnp.float32)              # [H, N, D]
    attn_out = jnp.sum(attn, axis=0)                                   # [N, D]

    h_res = x + attn_out                     # h = attn_out + x

    # ---------- MLP branch (SwiGLU) ----------
    hn = _rms_norm(h_res, mlp_w_ref[...])
    g = jnp.dot(hn, w1_ref[...], preferred_element_type=jnp.float32)
    u = jnp.dot(hn, w3_ref[...], preferred_element_type=jnp.float32)
    act = g * jax.nn.sigmoid(g)              # SiLU
    mlp_out = jnp.dot(act * u, w2_ref[...], preferred_element_type=jnp.float32)

    out_ref[...] = h_res + mlp_out           # out = h + mlp_out


def decoder_layer(x, sa_w, mlp_w, wq, wk, wv, wo, w1, w3, w2, cos, sin):
    """Wrapper: weight re-parameterization (layout plumbing) + single-block call."""
    q_per_kv = NUM_HEADS // NUM_KV_HEADS
    scale = 1.0 / math.sqrt(HEAD_DIM)
    half = HEAD_DIM // 2

    # signed rotate-half permutation:  (t @ R) == concat([-t[half:], t[:half]])
    R_np = np.zeros((HEAD_DIM, HEAD_DIM), np.float32)
    for j in range(half):
        R_np[j + half, j] = -1.0
        R_np[j, j + half] = 1.0
    R = jnp.asarray(R_np)

    def split_in(w, n_heads):                # [D, n*hd] -> [n, D, hd]
        return jnp.transpose(w.reshape(D, n_heads, HEAD_DIM), (1, 0, 2))

    wq_h = split_in(wq, NUM_HEADS) * scale           # fold 1/sqrt(hd) into q proj
    wk_h = split_in(wk, NUM_KV_HEADS)
    wv_h = split_in(wv, NUM_KV_HEADS)
    kv_idx = np.arange(NUM_HEADS) // q_per_kv        # GQA kv-head sharing
    wk_h = wk_h[kv_idx]                              # [H, D, hd]
    wv_h = wv_h[kv_idx]                              # [H, D, hd]
    wq_rot_h = jnp.einsum('hdf,fg->hdg', wq_h, R)    # fold rotate-half into weights
    wk_rot_h = jnp.einsum('hdf,fg->hdg', wk_h, R)
    wo_h = wo.reshape(NUM_HEADS, HEAD_DIM, D)        # [H, hd, D]

    # flattened-token RoPE tables (position of row n is n % S)
    cos_flat = jnp.tile(cos, (B, 1))                 # [N, hd]
    sin_flat = jnp.tile(sin, (B, 1))

    # block-diagonal causal additive bias over the flattened token axis
    r = np.arange(N_TOK)
    same_batch = (r[:, None] // S) == (r[None, :] // S)
    causal = (r[:, None] % S) >= (r[None, :] % S)
    bias = jnp.asarray(np.where(same_batch & causal, 0.0, -1e30).astype(np.float32))

    x_flat = x.reshape(N_TOK, D)

    args = (x_flat, sa_w, mlp_w, wq_h, wq_rot_h, wk_h, wk_rot_h, wv_h, wo_h,
            w1, w3, w2, cos_flat, sin_flat, bias)

    out_flat = pl.pallas_call(
        decoder_layer_kernel,
        out_shape=jax.ShapeDtypeStruct((N_TOK, D), jnp.float32),
        in_specs=[pl.BlockSpec(memory_space=pltpu.MemorySpace.VMEM)
                  for _ in args],
        out_specs=pl.BlockSpec(memory_space=pltpu.MemorySpace.VMEM),
    )(*args)
    return out_flat.reshape(B, S, D)


def numpy_reference(x, sa_w, mlp_w, wq, wk, wv, wo, w1, w3, w2, cos, sin):
    x = np.asarray(x, np.float32)
    cos = np.asarray(cos, np.float32)
    sin = np.asarray(sin, np.float32)

    def rms(v, w):
        ms = np.mean(v * v, axis=-1, keepdims=True)
        return v / np.sqrt(ms + EPS) * np.asarray(w, np.float32)

    def rope(t):
        half = HEAD_DIM // 2
        rot = np.concatenate([-t[:, half:], t[:, :half]], axis=-1)
        return t * cos + rot * sin

    scale = 1.0 / math.sqrt(HEAD_DIM)
    causal = np.tril(np.ones((S, S), dtype=bool))
    q_per_kv = NUM_HEADS // NUM_KV_HEADS
    out = np.zeros_like(x)
    for b in range(B):
        xb = x[b]
        xn = rms(xb, sa_w)
        q = xn @ np.asarray(wq); k = xn @ np.asarray(wk); v = xn @ np.asarray(wv)
        heads = []
        for h in range(NUM_HEADS):
            kvh = h // q_per_kv
            qh = rope(q[:, h * HEAD_DIM:(h + 1) * HEAD_DIM])
            kh = rope(k[:, kvh * HEAD_DIM:(kvh + 1) * HEAD_DIM])
            vh = v[:, kvh * HEAD_DIM:(kvh + 1) * HEAD_DIM]
            s = (qh @ kh.T) * scale
            s = np.where(causal, s, -1e30)
            s = s - s.max(-1, keepdims=True)
            p = np.exp(s); p = p / p.sum(-1, keepdims=True)
            heads.append(p @ vh)
        attn_out = np.concatenate(heads, axis=-1) @ np.asarray(wo)
        h_res = xb + attn_out
        hn = rms(h_res, mlp_w)
        g = hn @ np.asarray(w1); u = hn @ np.asarray(w3)
        act = g * (1.0 / (1.0 + np.exp(-g)))
        out[b] = h_res + (act * u) @ np.asarray(w2)
    return out


if __name__ == "__main__":
    key = jax.random.PRNGKey(0)
    ks = jax.random.split(key, 8)
    std = 0.02
    x = jax.random.normal(ks[0], (B, S, D), dtype=jnp.float32)
    sa_w = jnp.ones((1, D), jnp.float32)     # RMSNorm scales init to 1
    mlp_w = jnp.ones((1, D), jnp.float32)
    wq = std * jax.random.normal(ks[1], (D, NUM_HEADS * HEAD_DIM), jnp.float32)
    wk = std * jax.random.normal(ks[2], (D, NUM_KV_HEADS * HEAD_DIM), jnp.float32)
    wv = std * jax.random.normal(ks[3], (D, NUM_KV_HEADS * HEAD_DIM), jnp.float32)
    wo = std * jax.random.normal(ks[4], (NUM_HEADS * HEAD_DIM, D), jnp.float32)
    w1 = std * jax.random.normal(ks[5], (D, MLP_HIDDEN), jnp.float32)
    w3 = std * jax.random.normal(ks[6], (D, MLP_HIDDEN), jnp.float32)
    w2 = std * jax.random.normal(ks[7], (MLP_HIDDEN, D), jnp.float32)

    # rotate-half RoPE tables (input_pos = token index, mask=None, kv_cache=None)
    # TODO(synk): incremental-decode path (KVCache.update + input_pos gather) is
    # not implemented; this kernel covers the full-sequence causal forward.
    pos = np.arange(S, dtype=np.float32)
    inv_freq = 1.0 / (ROPE_BASE ** (np.arange(0, HEAD_DIM, 2, dtype=np.float32) / HEAD_DIM))
    ang = np.outer(pos, inv_freq)                          # [S, hd/2]
    cos = jnp.asarray(np.concatenate([np.cos(ang), np.cos(ang)], -1), jnp.float32)
    sin = jnp.asarray(np.concatenate([np.sin(ang), np.sin(ang)], -1), jnp.float32)

    args = (x, sa_w, mlp_w, wq, wk, wv, wo, w1, w3, w2, cos, sin)
    out = decoder_layer(*args)
    out = jax.block_until_ready(out)

    ref = numpy_reference(*args)
    np.testing.assert_allclose(np.asarray(out), ref, rtol=2e-3, atol=2e-3)
    print("KERNEL_OK")
</pallas_src>

<mosaic_0001>
module attributes {stable_mosaic.version = 11 : i64} {
  func.func @decoder_layer_kernel(%arg0: memref<16x32xf32, #tpu.memory_space<vmem>>, %arg1: memref<1x32xf32, #tpu.memory_space<vmem>>, %arg2: memref<1x32xf32, #tpu.memory_space<vmem>>, %arg3: memref<4x32x8xf32, #tpu.memory_space<vmem>>, %arg4: memref<4x32x8xf32, #tpu.memory_space<vmem>>, %arg5: memref<4x32x8xf32, #tpu.memory_space<vmem>>, %arg6: memref<4x32x8xf32, #tpu.memory_space<vmem>>, %arg7: memref<4x32x8xf32, #tpu.memory_space<vmem>>, %arg8: memref<4x8x32xf32, #tpu.memory_space<vmem>>, %arg9: memref<32x64xf32, #tpu.memory_space<vmem>>, %arg10: memref<32x64xf32, #tpu.memory_space<vmem>>, %arg11: memref<64x32xf32, #tpu.memory_space<vmem>>, %arg12: memref<16x8xf32, #tpu.memory_space<vmem>>, %arg13: memref<16x8xf32, #tpu.memory_space<vmem>>, %arg14: memref<16x16xf32, #tpu.memory_space<vmem>>, %arg15: memref<16x32xf32, #tpu.memory_space<vmem>>) attributes {dimension_semantics = [], scalar_prefetch = 0 : i64, scratch_operands = 0 : i64, tpu.core_type = #tpu.core_type<tc>} {
    %c0 = arith.constant 0 : index
    %c0_0 = arith.constant 0 : index
    %0 = vector.load %arg0[%c0, %c0_0] : memref<16x32xf32, #tpu.memory_space<vmem>>, vector<16x32xf32>
    %c0_1 = arith.constant 0 : index
    %c0_2 = arith.constant 0 : index
    %1 = vector.load %arg12[%c0_1, %c0_2] : memref<16x8xf32, #tpu.memory_space<vmem>>, vector<16x8xf32>
    %2 = vector.shape_cast %1 : vector<16x8xf32> to vector<1x16x8xf32>
    %c0_3 = arith.constant 0 : index
    %c0_4 = arith.constant 0 : index
    %3 = vector.load %arg13[%c0_3, %c0_4] : memref<16x8xf32, #tpu.memory_space<vmem>>, vector<16x8xf32>
    %4 = vector.shape_cast %3 : vector<16x8xf32> to vector<1x16x8xf32>
    %c0_5 = arith.constant 0 : index
    %c0_6 = arith.constant 0 : index
    %5 = vector.load %arg1[%c0_5, %c0_6] : memref<1x32xf32, #tpu.memory_space<vmem>>, vector<1x32xf32>
    %6 = arith.mulf %0, %0 : vector<16x32xf32>
    %cst = arith.constant dense<0.000000e+00> : vector<16xf32>
    %7 = vector.multi_reduction <add>, %6, %cst [1] : vector<16x32xf32> to vector<16xf32>
    %8 = vector.shape_cast %7 : vector<16xf32> to vector<16x1xf32>
    %cst_7 = arith.constant 3.200000e+01 : f32
    %9 = vector.broadcast %cst_7 : f32 to vector<16x1xf32>
    %10 = arith.divf %8, %9 : vector<16x1xf32>
    %cst_8 = arith.constant 9.99999997E-7 : f32
    %11 = vector.broadcast %cst_8 : f32 to vector<16x1xf32>
    %12 = arith.addf %10, %11 : vector<16x1xf32>
    %13 = math.rsqrt %12 : vector<16x1xf32>
    %14 = vector.broadcast %13 : vector<16x1xf32> to vector<16x32xf32>
    %15 = arith.mulf %0, %14 : vector<16x32xf32>
    %16 = vector.broadcast %5 : vector<1x32xf32> to vector<16x32xf32>
    %17 = arith.mulf %15, %16 : vector<16x32xf32>
    %18 = vector.shape_cast %17 : vector<16x32xf32> to vector<1x16x32xf32>
    %19 = vector.shape_cast %18 : vector<1x16x32xf32> to vector<1x16x32xf32>
    %20 = vector.broadcast %19 : vector<1x16x32xf32> to vector<4x16x32xf32>
    %c0_9 = arith.constant 0 : index
    %c0_10 = arith.constant 0 : index
    %c0_11 = arith.constant 0 : index
    %21 = vector.load %arg3[%c0_9, %c0_10, %c0_11] : memref<4x32x8xf32, #tpu.memory_space<vmem>>, vector<4x32x8xf32>
    "tpu.trace_start"() <{level = 10 : i32, message = "hnd,hdf->hnf"}> : () -> ()
    %cst_12 = arith.constant dense<0.000000e+00> : vector<4x16x8xf32>
    %22 = tpu.matmul %20, %21, %cst_12 {dimension_numbers = #tpu.dot_dimension_numbers<[2], [1], [1], [2], [0, 0, 0, 1, 1, 2], [0], [0]>} : vector<4x16x32xf32>, vector<4x32x8xf32>, vector<4x16x8xf32> -> vector<4x16x8xf32>
    "tpu.trace_stop"() : () -> ()
    %c0_13 = arith.constant 0 : index
    %c0_14 = arith.constant 0 : index
    %c0_15 = arith.constant 0 : index
    %23 = vector.load %arg4[%c0_13, %c0_14, %c0_15] : memref<4x32x8xf32, #tpu.memory_space<vmem>>, vector<4x32x8xf32>
    "tpu.trace_start"() <{level = 10 : i32, message = "hnd,hdf->hnf"}> : () -> ()
    %cst_16 = arith.constant dense<0.000000e+00> : vector<4x16x8xf32>
    %24 = tpu.matmul %20, %23, %cst_16 {dimension_numbers = #tpu.dot_dimension_numbers<[2], [1], [1], [2], [0, 0, 0, 1, 1, 2], [0], [0]>} : vector<4x16x32xf32>, vector<4x32x8xf32>, vector<4x16x8xf32> -> vector<4x16x8xf32>
    "tpu.trace_stop"() : () -> ()
    %c0_17 = arith.constant 0 : index
    %c0_18 = arith.constant 0 : index
    %c0_19 = arith.constant 0 : index
    %25 = vector.load %arg5[%c0_17, %c0_18, %c0_19] : memref<4x32x8xf32, #tpu.memory_space<vmem>>, vector<4x32x8xf32>
    "tpu.trace_start"() <{level = 10 : i32, message = "hnd,hdf->hnf"}> : () -> ()
    %cst_20 = arith.constant dense<0.000000e+00> : vector<4x16x8xf32>
    %26 = tpu.matmul %20, %25, %cst_20 {dimension_numbers = #tpu.dot_dimension_numbers<[2], [1], [1], [2], [0, 0, 0, 1, 1, 2], [0], [0]>} : vector<4x16x32xf32>, vector<4x32x8xf32>, vector<4x16x8xf32> -> vector<4x16x8xf32>
    "tpu.trace_stop"() : () -> ()
    %c0_21 = arith.constant 0 : index
    %c0_22 = arith.constant 0 : index
    %c0_23 = arith.constant 0 : index
    %27 = vector.load %arg6[%c0_21, %c0_22, %c0_23] : memref<4x32x8xf32, #tpu.memory_space<vmem>>, vector<4x32x8xf32>
    "tpu.trace_start"() <{level = 10 : i32, message = "hnd,hdf->hnf"}> : () -> ()
    %cst_24 = arith.constant dense<0.000000e+00> : vector<4x16x8xf32>
    %28 = tpu.matmul %20, %27, %cst_24 {dimension_numbers = #tpu.dot_dimension_numbers<[2], [1], [1], [2], [0, 0, 0, 1, 1, 2], [0], [0]>} : vector<4x16x32xf32>, vector<4x32x8xf32>, vector<4x16x8xf32> -> vector<4x16x8xf32>
    "tpu.trace_stop"() : () -> ()
    %c0_25 = arith.constant 0 : index
    %c0_26 = arith.constant 0 : index
    %c0_27 = arith.constant 0 : index
    %29 = vector.load %arg7[%c0_25, %c0_26, %c0_27] : memref<4x32x8xf32, #tpu.memory_space<vmem>>, vector<4x32x8xf32>
    "tpu.trace_start"() <{level = 10 : i32, message = "hnd,hdf->hnf"}> : () -> ()
    %cst_28 = arith.constant dense<0.000000e+00> : vector<4x16x8xf32>
    %30 = tpu.matmul %20, %29, %cst_28 {dimension_numbers = #tpu.dot_dimension_numbers<[2], [1], [1], [2], [0, 0, 0, 1, 1, 2], [0], [0]>} : vector<4x16x32xf32>, vector<4x32x8xf32>, vector<4x16x8xf32> -> vector<4x16x8xf32>
    "tpu.trace_stop"() : () -> ()
    %31 = vector.broadcast %2 : vector<1x16x8xf32> to vector<4x16x8xf32>
    %32 = arith.mulf %22, %31 : vector<4x16x8xf32>
    %33 = vector.broadcast %4 : vector<1x16x8xf32> to vector<4x16x8xf32>
    %34 = arith.mulf %24, %33 : vector<4x16x8xf32>
    %35 = arith.addf %32, %34 : vector<4x16x8xf32>
    %36 = vector.broadcast %2 : vector<1x16x8xf32> to vector<4x16x8xf32>
    %37 = arith.mulf %26, %36 : vector<4x16x8xf32>
    %38 = vector.broadcast %4 : vector<1x16x8xf32> to vector<4x16x8xf32>
    %39 = arith.mulf %28, %38 : vector<4x16x8xf32>
    %40 = arith.addf %37, %39 : vector<4x16x8xf32>
    "tpu.trace_start"() <{level = 10 : i32, message = "hqf,hkf->hqk"}> : () -> ()
    %cst_29 = arith.constant dense<0.000000e+00> : vector<4x16x16xf32>
    %41 = tpu.matmul %35, %40, %cst_29 {dimension_numbers = #tpu.dot_dimension_numbers<[2], [2], [1], [1], [0, 0, 0, 1, 1, 1], [0], [0]>} : vector<4x16x8xf32>, vector<4x16x8xf32>, vector<4x16x16xf32> -> vector<4x16x16xf32>
    "tpu.trace_stop"() : () -> ()
    %c0_30 = arith.constant 0 : index
    %c0_31 = arith.constant 0 : index
    %42 = vector.load %arg14[%c0_30, %c0_31] : memref<16x16xf32, #tpu.memory_space<vmem>>, vector<16x16xf32>
    %43 = vector.shape_cast %42 : vector<16x16xf32> to vector<1x16x16xf32>
    %44 = vector.broadcast %43 : vector<1x16x16xf32> to vector<4x16x16xf32>
    %45 = arith.addf %41, %44 : vector<4x16x16xf32>
    %cst_32 = arith.constant dense<0xFF800000> : vector<4x16xf32>
    %46 = vector.multi_reduction <maximumf>, %45, %cst_32 [2] : vector<4x16x16xf32> to vector<4x16xf32>
    %47 = vector.shape_cast %46 : vector<4x16xf32> to vector<4x16x1xf32>
    %48 = vector.broadcast %47 : vector<4x16x1xf32> to vector<4x16x16xf32>
    %49 = arith.subf %45, %48 : vector<4x16x16xf32>
    %50 = math.exp %49 : vector<4x16x16xf32>
    %cst_33 = arith.constant dense<0.000000e+00> : vector<4x16xf32>
    %51 = vector.multi_reduction <add>, %50, %cst_33 [2] : vector<4x16x16xf32> to vector<4x16xf32>
    %52 = vector.shape_cast %51 : vector<4x16xf32> to vector<4x16x1xf32>
    %53 = tpu.reciprocal %52 {approx = true} : vector<4x16x1xf32> -> vector<4x16x1xf32>
    %54 = vector.broadcast %53 : vector<4x16x1xf32> to vector<4x16x16xf32>
    %55 = arith.mulf %50, %54 : vector<4x16x16xf32>
    "tpu.trace_start"() <{level = 10 : i32, message = "hqk,hkf->hqf"}> : () -> ()
    %cst_34 = arith.constant dense<0.000000e+00> : vector<4x16x8xf32>
    %56 = tpu.matmul %55, %30, %cst_34 {dimension_numbers = #tpu.dot_dimension_numbers<[2], [1], [1], [2], [0, 0, 0, 1, 1, 2], [0], [0]>} : vector<4x16x16xf32>, vector<4x16x8xf32>, vector<4x16x8xf32> -> vector<4x16x8xf32>
    "tpu.trace_stop"() : () -> ()
    %c0_35 = arith.constant 0 : index
    %c0_36 = arith.constant 0 : index
    %c0_37 = arith.constant 0 : index
    %57 = vector.load %arg8[%c0_35, %c0_36, %c0_37] : memref<4x8x32xf32, #tpu.memory_space<vmem>>, vector<4x8x32xf32>
    "tpu.trace_start"() <{level = 10 : i32, message = "hnf,hfd->hnd"}> : () -> ()
    %cst_38 = arith.constant dense<0.000000e+00> : vector<4x16x32xf32>
    %58 = tpu.matmul %56, %57, %cst_38 {dimension_numbers = #tpu.dot_dimension_numbers<[2], [1], [1], [2], [0, 0, 0, 1, 1, 2], [0], [0]>} : vector<4x16x8xf32>, vector<4x8x32xf32>, vector<4x16x32xf32> -> vector<4x16x32xf32>
    "tpu.trace_stop"() : () -> ()
    %cst_39 = arith.constant dense<0.000000e+00> : vector<16x32xf32>
    %59 = vector.multi_reduction <add>, %58, %cst_39 [0] : vector<4x16x32xf32> to vector<16x32xf32>
    %60 = arith.addf %0, %59 : vector<16x32xf32>
    %c0_40 = arith.constant 0 : index
    %c0_41 = arith.constant 0 : index
    %61 = vector.load %arg2[%c0_40, %c0_41] : memref<1x32xf32, #tpu.memory_space<vmem>>, vector<1x32xf32>
    %62 = arith.mulf %60, %60 : vector<16x32xf32>
    %cst_42 = arith.constant dense<0.000000e+00> : vector<16xf32>
    %63 = vector.multi_reduction <add>, %62, %cst_42 [1] : vector<16x32xf32> to vector<16xf32>
    %64 = vector.shape_cast %63 : vector<16xf32> to vector<16x1xf32>
    %cst_43 = arith.constant 3.200000e+01 : f32
    %65 = vector.broadcast %cst_43 : f32 to vector<16x1xf32>
    %66 = arith.divf %64, %65 : vector<16x1xf32>
    %cst_44 = arith.constant 9.99999997E-7 : f32
    %67 = vector.broadcast %cst_44 : f32 to vector<16x1xf32>
    %68 = arith.addf %66, %67 : vector<16x1xf32>
    %69 = math.rsqrt %68 : vector<16x1xf32>
    %70 = vector.broadcast %69 : vector<16x1xf32> to vector<16x32xf32>
    %71 = arith.mulf %60, %70 : vector<16x32xf32>
    %72 = vector.broadcast %61 : vector<1x32xf32> to vector<16x32xf32>
    %73 = arith.mulf %71, %72 : vector<16x32xf32>
    %c0_45 = arith.constant 0 : index
    %c0_46 = arith.constant 0 : index
    %74 = vector.load %arg9[%c0_45, %c0_46] : memref<32x64xf32, #tpu.memory_space<vmem>>, vector<32x64xf32>
    %cst_47 = arith.constant dense<0.000000e+00> : vector<16x64xf32>
    %75 = tpu.matmul %73, %74, %cst_47 {dimension_numbers = #tpu.dot_dimension_numbers<[1], [0], [0], [1], [0, 0, 1, 1], [], []>} : vector<16x32xf32>, vector<32x64xf32>, vector<16x64xf32> -> vector<16x64xf32>
    %c0_48 = arith.constant 0 : index
    %c0_49 = arith.constant 0 : index
    %76 = vector.load %arg10[%c0_48, %c0_49] : memref<32x64xf32, #tpu.memory_space<vmem>>, vector<32x64xf32>
    %cst_50 = arith.constant dense<0.000000e+00> : vector<16x64xf32>
    %77 = tpu.matmul %73, %76, %cst_50 {dimension_numbers = #tpu.dot_dimension_numbers<[1], [0], [0], [1], [0, 0, 1, 1], [], []>} : vector<16x32xf32>, vector<32x64xf32>, vector<16x64xf32> -> vector<16x64xf32>
    %78 = arith.negf %75 : vector<16x64xf32>
    %79 = math.exp %78 : vector<16x64xf32>
    %cst_51 = arith.constant 1.000000e+00 : f32
    %80 = vector.broadcast %cst_51 : f32 to vector<16x64xf32>
    %81 = arith.addf %80, %79 : vector<16x64xf32>
    %82 = arith.divf %80, %81 : vector<16x64xf32>
    %83 = arith.mulf %75, %82 : vector<16x64xf32>
    %84 = arith.mulf %83, %77 : vector<16x64xf32>
    %c0_52 = arith.constant 0 : index
    %c0_53 = arith.constant 0 : index
    %85 = vector.load %arg11[%c0_52, %c0_53] : memref<64x32xf32, #tpu.memory_space<vmem>>, vector<64x32xf32>
    %cst_54 = arith.constant dense<0.000000e+00> : vector<16x32xf32>
    %86 = tpu.matmul %84, %85, %cst_54 {dimension_numbers = #tpu.dot_dimension_numbers<[1], [0], [0], [1], [0, 0, 1, 1], [], []>} : vector<16x64xf32>, vector<64x32xf32>, vector<16x32xf32> -> vector<16x32xf32>
    %87 = arith.addf %60, %86 : vector<16x32xf32>
    %c0_55 = arith.constant 0 : index
    %c0_56 = arith.constant 0 : index
    %88 = vector.load %arg15[%c0_55, %c0_56] : memref<16x32xf32, #tpu.memory_space<vmem>>, vector<16x32xf32>
    tpu.vector_store %arg15[%c0_55, %c0_56], %87 {strides = array<i32>} : memref<16x32xf32, #tpu.memory_space<vmem>>, vector<16x32xf32>,
    return
  }
}

</mosaic_0001>

<bundles_post_ra>
// kernel: tpu_custom_call.1
= control target key start
LH: loop header
LB: loop body
LE: loop exit
PB: predicated region body
PF: predicated region fallthrough
CT: control target
= control target key end

     0   :  { %vm60_vm0 = vcmask 261120   ;;  %s2212_s0 = inlined_call_operand.vmem [shape: f32[16,32], index: 0, kind: input, shape index: {}]   ;;  %s2213_s1 = inlined_call_operand.vmem [shape: f32[1,32], index: 1, kind: input, shape index: {}]   ;;  %s2214_s2 = inlined_call_operand.vmem [shape: f32[1,32], index: 2, kind: input, shape index: {}]   ;;  %s2215_s3 = inlined_call_operand.vmem [shape: f32[4,32,8], index: 3, kind: input, shape index: {}]   ;;  %s2216_s4 = inlined_call_operand.vmem [shape: f32[4,32,8], index: 4, kind: input, shape index: {}]   ;;  %s2217_s5 = inlined_call_operand.vmem [shape: f32[4,32,8], index: 5, kind: input, shape index: {}]   ;;  %s2218_s6 = inlined_call_operand.vmem [shape: f32[4,32,8], index: 6, kind: input, shape index: {}]   ;;  %s2219_s7 = inlined_call_operand.vmem [shape: f32[4,32,8], index: 7, kind: input, shape index: {}]   ;;  %s2220_s8 = inlined_call_operand.vmem [shape: f32[4,8,32], index: 8, kind: input, shape index: {}]   ;;  %s2221_s9 = inlined_call_operand.vmem [shape: f32[32,64], index: 9, kind: input, shape index: {}]   ;;  %s2222_s10 = inlined_call_operand.vmem [shape: f32[32,64], index: 10, kind: input, shape index: {}]   ;;  %s2223_s11 = inlined_call_operand.vmem [shape: f32[64,32], index: 11, kind: input, shape index: {}]   ;;  %s2224_s12 = inlined_call_operand.vmem [shape: f32[16,8], index: 12, kind: input, shape index: {}]   ;;  %s2225_s13 = inlined_call_operand.vmem [shape: f32[16,8], index: 13, kind: input, shape index: {}]   ;;  %s2226_s14 = inlined_call_operand.vmem [shape: f32[16,16], index: 14, kind: input, shape index: {}]   ;;  %s2227_s15 = inlined_call_operand.hbm [shape: f32[16,32], index: 15, kind: output, shape index: {}]  }
   0x1   :  { %v1640_v0 = vld [vmem:[%s2212_s0 + $0x8] sm:$0xff] }
   0x2   :  { %v59_v1 = vmul.f32 %v1640_v0, %v1640_v0 }
   0x3   :  { %20 = vsyncpa [#allocation3], 0  ;;  %v1647_v2 = vld [vmem:[%s2212_s0] sm:$0xff]  ;;  %v1553_v6 = vmov 32.0   ;;  %v108_v10 = vld [vmem:[%s2215_s3 + $0x18] sm:$0xff]  ;;  %vm701_vm8 = vcmask 64512  }
   0x4   :  { %v64_v3 = vsel %vm60_vm0, %v59_v1, 0.0  ;;  %v58_v4 = vmul.f32 %v1647_v2, %v1647_v2  ;;  %1475 = vrcp.f32 %v1553_v6  ;;  %1465 = vmatpush.msra.mxu3 %v108_v10  ;;  %139 = vmatpush.msra.mxu0 %v108_v10  ;;  %v107_v11 = vld [vmem:[%s2215_s3 + $0x10] sm:$0xff]  ;;  %v106_v13 = vld [vmem:[%s2215_s3 + $0x8] sm:$0xff]  ;;  %v105_v14 = vld [vmem:[%s2215_s3] sm:$0xff]  ;;  %vm842_vm9 = vcmask 130048  }
   0x5   :  { %65 = vadd.xlane.f32.xlu0 %v64_v3  ;;  %v112_v16 = vld [vmem:[%s2215_s3 + $0x38] sm:$0xff]  ;;  %v111_v19 = vld [vmem:[%s2215_s3 + $0x30] sm:$0xff]  ;;  %v110_v23 = vld [vmem:[%s2215_s3 + $0x28] sm:$0xff] }
   0x6   :  { %v61_v5 = vsel %vm60_vm0, %v58_v4, 0.0  ;;  %1466 = vmatpush.msra.mxu3 %v107_v11  ;;  %140 = vmatpush.msra.mxu0 %v107_v11  ;;  %v116_v17 = vld [vmem:[%s2215_s3 + $0x58] sm:$0xff]  ;;  %v115_v20 = vld [vmem:[%s2215_s3 + $0x50] sm:$0xff]  ;;  %v114_v24 = vld [vmem:[%s2215_s3 + $0x48] sm:$0xff] }
   0x7   :  { %v120_v18 = vld [vmem:[%s2215_s3 + $0x78] sm:$0xff]  ;;  %162 = vmatpush.msra.mxu1 %v112_v16  ;;  %185 = vmatpush.msra.mxu2 %v116_v17  ;;  %v119_v21 = vld [vmem:[%s2215_s3 + $0x70] sm:$0xff]  ;;  %v118_v25 = vld [vmem:[%s2215_s3 + $0x68] sm:$0xff] }
   0x8   :  { %1467 = vmatpush.msra.mxu3 %v106_v13  ;;  %141 = vmatpush.msra.mxu0 %v106_v13  ;;  %v109_v28 = vld [vmem:[%s2215_s3 + $0x20] sm:$0xff]  ;;  %v222_v32 = vld [vmem:[%s2216_s4 + $0x18] sm:$0xff]  ;;  %v221_v33 = vld [vmem:[%s2216_s4 + $0x10] sm:$0xff] }
   0x9   :  { %163 = vmatpush.msra.mxu1 %v111_v19  ;;  %186 = vmatpush.msra.mxu2 %v115_v20  ;;  %v113_v29 = vld [vmem:[%s2215_s3 + $0x40] sm:$0xff]  ;;  %v220_v34 = vld [vmem:[%s2216_s4 + $0x8] sm:$0xff]  ;;  %v226_v41 = vld [vmem:[%s2216_s4 + $0x38] sm:$0xff] }
   0xa   :  { %v1476_v7 = vpop.eup %1475  ;;  %1468 = vmatpush.msra.mxu3 %v105_v14  ;;  %142 = vmatpush.msra.mxu0 %v105_v14  ;;  %v117_v30 = vld [vmem:[%s2215_s3 + $0x60] sm:$0xff]  ;;  %v230_v42 = vld [vmem:[%s2216_s4 + $0x58] sm:$0xff]  ;;  %v225_v43 = vld [vmem:[%s2216_s4 + $0x30] sm:$0xff]  ;;  %s1555_s3 = smov 128  }
   0xb   :  { %v68_v8 = vmul.f32 32.0, %v1476_v7  ;;  %vm72_vm1 = vweird.f32 %v1476_v7  ;;  %164 = vmatpush.msra.mxu1 %v110_v23  ;;  %187 = vmatpush.msra.mxu2 %v114_v24  ;;  %v219_v36 = vld [vmem:[%s2216_s4] sm:$0xff]  ;;  %v229_v44 = vld [vmem:[%s2216_s4 + $0x50] sm:$0xff]  ;;  %v224_v46 = vld [vmem:[%s2216_s4 + $0x28] sm:$0xff] }
   0xc   :  { %208 = vmatpush.msrb.mxu3 %v120_v18  ;;  %247 = vmatpush.msrb.mxu0 %v222_v32  ;;  %v228_v47 = vld [vmem:[%s2216_s4 + $0x48] sm:$0xff]  ;;  %v223_v49 = vld [vmem:[%s2216_s4 + $0x20] sm:$0xff]  ;;  %v234_v61 = vld [vmem:[%s2216_s4 + $0x78] sm:$0xff] }
   0xd   :  { %62 = vadd.xlane.f32.xlu0 %v61_v5  ;;  %v69_v9 = vsub.f32 1.0, %v68_v8  ;;  %165 = vmatpush.msra.mxu1 %v109_v28  ;;  %v227_v50 = vld [vmem:[%s2216_s4 + $0x40] sm:$0xff]  ;;  %v233_v63 = vld [vmem:[%s2216_s4 + $0x70] sm:$0xff]  ;;  %v334_v8 = vld [vmem:[%s2217_s5 + $0x38] sm:$0xff] }
   0xe   :  { %209 = vmatpush.msrb.mxu3 %v119_v21  ;;  %188 = vmatpush.msra.mxu2 %v113_v29  ;;  %v1473_v55 = vld [vmem:[%s2213_s1] ss:$0 sm:$0xff]  ;;  %v329_v10 = vld [vmem:[%s2217_s5 + $0x10] sm:$0xff]  ;;  %v328_v14 = vld [vmem:[%s2217_s5 + $0x8] sm:$0xff] }
   0xf   :  { %v70_v12 = vmul.f32 %v1476_v7, %v69_v9  ;;  %248 = vmatpush.msrb.mxu0 %v221_v33  ;;  %270 = vmatpush.msrb.mxu1 %v226_v41  ;;  %v231_v5 = vld [vmem:[%s2216_s4 + $0x60] sm:$0xff]  ;;  %v342_v9 = vld [vmem:[%s2217_s5 + $0x78] sm:$0xff]  ;;  %v333_v11 = vld [vmem:[%s2217_s5 + $0x30] sm:$0xff] }
  0x10   :  { %210 = vmatpush.msrb.mxu3 %v118_v25  ;;  %293 = vmatpush.msrb.mxu2 %v230_v42  ;;  %v341_v13 = vld [vmem:[%s2217_s5 + $0x70] sm:$0xff]  ;;  %v336_v16 = vld [vmem:[%s2217_s5 + $0x48] sm:$0xff]  ;;  %v327_v18 = vld [vmem:[%s2217_s5] sm:$0xff] }
  0x11   :  { %v71_v15 = vadd.f32 %v1476_v7, %v70_v12  ;;  %249 = vmatpush.msrb.mxu0 %v220_v34  ;;  %271 = vmatpush.msrb.mxu1 %v225_v43  ;;  %v337_v12 = vld [vmem:[%s2217_s5 + $0x50] sm:$0xff]  ;;  %v340_v17 = vld [vmem:[%s2217_s5 + $0x68] sm:$0xff]  ;;  %v331_v19 = vld [vmem:[%s2217_s5 + $0x20] sm:$0xff] }
  0x12   :  { %211 = vmatpush.msrb.mxu3 %v117_v30  ;;  %294 = vmatpush.msrb.mxu2 %v229_v44  ;;  %v335_v20 = vld [vmem:[%s2217_s5 + $0x40] sm:$0xff]  ;;  %v438_v23 = vld [vmem:[%s2218_s6 + $0x18] sm:$0xff]  ;;  %v437_v24 = vld [vmem:[%s2218_s6 + $0x10] sm:$0xff] }
  0x13   :  { %v1683_v22 = vsel %vm72_vm1, %v1476_v7, %v71_v15  ;;  %250 = vmatpush.msrb.mxu0 %v219_v36  ;;  %272 = vmatpush.msrb.mxu1 %v224_v46  ;;  %v330_v7 = vld [vmem:[%s2217_s5 + $0x18] sm:$0xff]  ;;  %v332_v15 = vld [vmem:[%s2217_s5 + $0x28] sm:$0xff]  ;;  %v339_v21 = vld [vmem:[%s2217_s5 + $0x60] sm:$0xff] }
  0x14   :  { %295 = vmatpush.msrb.mxu2 %v228_v47  ;;  %v436_v25 = vld [vmem:[%s2218_s6 + $0x8] sm:$0xff]  ;;  %v450_v28 = vld [vmem:[%s2218_s6 + $0x78] sm:$0xff]  ;;  %v435_v29 = vld [vmem:[%s2218_s6] sm:$0xff] }
  0x15   :  { %273 = vmatpush.msrb.mxu1 %v223_v49  ;;  %v441_v30 = vld [vmem:[%s2218_s6 + $0x30] sm:$0xff]  ;;  %v440_v33 = vld [vmem:[%s2218_s6 + $0x28] sm:$0xff]  ;;  %v439_v36 = vld [vmem:[%s2218_s6 + $0x20] sm:$0xff] }
  0x16   :  { %296 = vmatpush.msrb.mxu2 %v227_v50  ;;  %v449_v32 = vld [vmem:[%s2218_s6 + $0x70] sm:$0xff]  ;;  %v444_v34 = vld [vmem:[%s2218_s6 + $0x48] sm:$0xff]  ;;  %v543_v42 = vld [vmem:[%s2219_s7] sm:$0xff] }
  0x17   :  { %v544_v41 = vld [vmem:[%s2219_s7 + $0x8] sm:$0xff]  ;;  %v550_v43 = vld [vmem:[%s2219_s7 + $0x38] sm:$0xff]  ;;  %v549_v46 = vld [vmem:[%s2219_s7 + $0x30] sm:$0xff] }
  0x18   :  { %v554_v44 = vld [vmem:[%s2219_s7 + $0x58] sm:$0xff]  ;;  %v553_v47 = vld [vmem:[%s2219_s7 + $0x50] sm:$0xff]  ;;  %v548_v49 = vld [vmem:[%s2219_s7 + $0x28] sm:$0xff] }
  0x19   :  { %v552_v50 = vld [vmem:[%s2219_s7 + $0x48] sm:$0xff] }
  0x78   :  { %v66_v26 = vpop.xlane.xlu0 %65 }
  0x79   :  { %v75_v27 = vmul.f32 %v1683_v22, %v66_v26  ;;  %v442_v26 = vld [vmem:[%s2218_s6 + $0x38] sm:$0xff] }
  0x7b   :  { %v77_v31 = vadd.f32 1e-06, %v75_v27  ;;  %v446_v27 = vld [vmem:[%s2218_s6 + $0x58] sm:$0xff] }
  0x7d   :  { %1477 = vrsqrt.f32 %v77_v31  ;;  %vm94_vm3 = vweird.f32 %v77_v31 }
  0x80   :  { %v63_v35 = vpop.xlane.xlu0 %62 }
  0x81   :  { %v74_v37 = vmul.f32 %v1683_v22, %v63_v35  ;;  %v448_v35 = vld [vmem:[%s2218_s6 + $0x68] sm:$0xff] }
  0x83   :  { %v1478_v38 = vpop.eup %1477  ;;  %v76_v39 = vadd.f32 1e-06, %v74_v37  ;;  %v443_v37 = vld [vmem:[%s2218_s6 + $0x40] sm:$0xff] }
  0x84   :  { %v89_v40 = vmul.f32 %v1478_v38, %v77_v31  ;;  %vm95_vm2 = vweird.f32 %v1478_v38  ;;  %v445_v31 = vld [vmem:[%s2218_s6 + $0x50] sm:$0xff] }
  0x85   :  { %1479 = vrsqrt.f32 %v76_v39  ;;  %vm96_vm4 = vmor %vm94_vm3, %vm95_vm2  ;;  %vm84_vm6 = vweird.f32 %v76_v39 }
  0x86   :  { %v90_v45 = vmul.f32 %v1478_v38, %v89_v40  ;;  %v545_v40 = vld [vmem:[%s2219_s7 + $0x10] sm:$0xff] }
  0x88   :  { %v91_v48 = vmul.f32 0.5, %v90_v45  ;;  %v558_v45 = vld [vmem:[%s2219_s7 + $0x78] sm:$0xff] }
  0x8a   :  { %v92_v51 = vsub.f32 1.5, %v91_v48  ;;  %v557_v48 = vld [vmem:[%s2219_s7 + $0x70] sm:$0xff] }
  0x8b   :  { %v1480_v52 = vpop.eup %1479 }
  0x8c   :  { %v93_v53 = vmul.f32 %v1478_v38, %v92_v51  ;;  %v79_v54 = vmul.f32 %v1480_v52, %v76_v39  ;;  %vm85_vm5 = vweird.f32 %v1480_v52  ;;  %v546_v39 = vld [vmem:[%s2219_s7 + $0x18] sm:$0xff]  ;;  %v556_v51 = vld [vmem:[%s2219_s7 + $0x68] sm:$0xff] }
  0x8d   :  { %vm86_vm7 = vmor %vm84_vm6, %vm85_vm5  ;;  %vm1333_vm5 = vcmask 523264  }
  0x8e   :  { %v97_v56 = vsel %vm96_vm4, %v1478_v38, %v93_v53  ;;  %v80_v57 = vmul.f32 %v1480_v52, %v79_v54  ;;  %v447_v38 = vld [vmem:[%s2218_s6 + $0x60] sm:$0xff] }
  0x8f   :  { %v99_v58 = vmul.f32 %v97_v56, %v1640_v0  ;;  %v232_v0 = vld [vmem:[%s2216_s4 + $0x68] sm:$0xff]  ;;  %v551_v53 = vld [vmem:[%s2219_s7 + $0x40] sm:$0xff]  ;;  %s1373_s4 = sshll.u32 %s2227_s15, 4  ;;  %s1374_s4 = int_to_ptr.hbm [resolvable:$true] %s1373_s4 }
  0x90   :  { %v81_v59 = vmul.f32 0.5, %v80_v57  ;;  %v555_v54 = vld [vmem:[%s2219_s7 + $0x60] sm:$0xff] }
  0x91   :  { %v1745_v60 = vmul.f32 %v1473_v55, %v99_v58 }
  0x92   :  { %v82_v62 = vsub.f32 1.5, %v81_v59 }
  0x93   :  { %1386 = vmatmul.msk.f32.vlgmr.msra.gmra.mxu3 %vm60_vm0, %v1745_v60 }
  0x94   :  { %v83_v1 = vmul.f32 %v1480_v52, %v82_v62  ;;  %316 = vmatpush.msra.mxu3 %v234_v61 }
  0x96   :  { %v87_v3 = vsel %vm86_vm7, %v1480_v52, %v83_v1  ;;  %317 = vmatpush.msra.mxu3 %v233_v63  ;;  %v547_v52 = vld [vmem:[%s2219_s7 + $0x20] sm:$0xff] }
  0x97   :  { %v98_v4 = vmul.f32 %v87_v3, %v1647_v2  ;;  %v338_v2 = vld [vmem:[%s2217_s5 + $0x58] sm:$0xff] }
  0x98   :  { %318 = vmatpush.msra.mxu3 %v232_v0 }
  0x99   :  { %v1762_v6 = vmul.f32 %v1473_v55, %v98_v4 }
  0x9a   :  { %319 = vmatpush.msra.mxu3 %v231_v5 }
  0x9b   :  { %1385 = vmatmul.msk.f32.vlgmr.msra.gmra.mxu0 %vm60_vm0, %v1762_v6  ;;  %1387 = vmatmul.msk.f32.vlgmr.msra.gmra.mxu1 %vm60_vm0, %v1762_v6 }
  0x9c   :  { %1389 = vmatmul.msk.f32.vlgmr.msra.gmra.mxu2 %vm60_vm0, %v1762_v6  ;;  %1391 = vmatmul.msk.f32.vlgmr.msrb.gmra.mxu3 %vm60_vm0, %v1762_v6 }
  0x9d   :  { %355 = vmatpush.msra.mxu0 %v330_v7  ;;  %378 = vmatpush.msra.mxu1 %v334_v8 }
  0x9e   :  { %401 = vmatpush.msra.mxu2 %v338_v2  ;;  %424 = vmatpush.msrb.mxu3 %v342_v9 }
  0x9f   :  { %356 = vmatpush.msra.mxu0 %v329_v10  ;;  %379 = vmatpush.msra.mxu1 %v333_v11 }
  0xa0   :  { %402 = vmatpush.msra.mxu2 %v337_v12  ;;  %425 = vmatpush.msrb.mxu3 %v341_v13 }
  0xa1   :  { %357 = vmatpush.msra.mxu0 %v328_v14  ;;  %380 = vmatpush.msra.mxu1 %v332_v15 }
  0xa2   :  { %403 = vmatpush.msra.mxu2 %v336_v16  ;;  %426 = vmatpush.msrb.mxu3 %v340_v17  ;;  %v2013_v16 = vld [vmem:[%s2224_s12 + $0x8] sm:$0xff] }
  0xa3   :  { %1388 = vmatmul.msk.f32.gmra.mxu1 %vm60_vm0, %v1745_v60  ;;  %1393 = vmatmul.msk.f32.vlgmr.msrb.gmra.mxu0 %vm60_vm0, %v1762_v6  ;;  %v2018_v17 = vld [vmem:[%s2225_s13 + $0x8] sm:$0xff] }
  0xa4   :  { %1390 = vmatmul.msk.f32.gmra.mxu2 %vm60_vm0, %v1745_v60  ;;  %1392 = vmatmul.msk.f32.gmra.mxu3 %vm60_vm0, %v1745_v60 }
  0xa5   :  { %358 = vmatpush.msra.mxu0 %v327_v18  ;;  %381 = vmatpush.msra.mxu1 %v331_v19 }
  0xa6   :  { %404 = vmatpush.msra.mxu2 %v335_v20  ;;  %427 = vmatpush.msrb.mxu3 %v339_v21 }
  0xa7   :  { %463 = vmatpush.msrb.mxu0 %v438_v23  ;;  %v55_v23 = vld [vmem:[%s2225_s13] sm:$0xff] }
  0xa9   :  { %464 = vmatpush.msrb.mxu0 %v437_v24 }
  0xab   :  { %1394 = vmatmul.msk.f32.gmra.mxu0 %vm60_vm0, %v1745_v60  ;;  %1395 = vmatmul.msk.f32.vlgmr.msrb.gmra.mxu1 %vm60_vm0, %v1762_v6 }
  0xac   :  { %1397 = vmatmul.msk.f32.vlgmr.msrb.gmra.mxu2 %vm60_vm0, %v1762_v6  ;;  %1399 = vmatmul.msk.f32.vlgmr.msra.gmra.mxu3 %vm60_vm0, %v1762_v6 }
  0xad   :  { %465 = vmatpush.msrb.mxu0 %v436_v25  ;;  %486 = vmatpush.msrb.mxu1 %v442_v26  ;;  %v53_v26 = vld [vmem:[%s2224_s12] sm:$0xff]  ;;  %s1556_s12 = smov 8  }
  0xae   :  { %509 = vmatpush.msrb.mxu2 %v446_v27  ;;  %532 = vmatpush.msra.mxu3 %v450_v28 }
  0xaf   :  { %466 = vmatpush.msrb.mxu0 %v435_v29  ;;  %487 = vmatpush.msrb.mxu1 %v441_v30 }
  0xb0   :  { %510 = vmatpush.msrb.mxu2 %v445_v31  ;;  %533 = vmatpush.msra.mxu3 %v449_v32 }
  0xb1   :  { %488 = vmatpush.msrb.mxu1 %v440_v33 }
  0xb2   :  { %511 = vmatpush.msrb.mxu2 %v444_v34  ;;  %534 = vmatpush.msra.mxu3 %v448_v35 }
  0xb3   :  { %1396 = vmatmul.msk.f32.gmra.mxu1 %vm60_vm0, %v1745_v60  ;;  %1401 = vmatmul.msk.f32.vlgmr.msra.gmra.mxu0 %vm60_vm0, %v1762_v6 }
  0xb4   :  { %1398 = vmatmul.msk.f32.gmra.mxu2 %vm60_vm0, %v1745_v60  ;;  %1400 = vmatmul.msk.f32.gmra.mxu3 %vm60_vm0, %v1745_v60 }
  0xb5   :  { %489 = vmatpush.msrb.mxu1 %v439_v36  ;;  %512 = vmatpush.msrb.mxu2 %v443_v37 }
  0xb6   :  { %535 = vmatpush.msra.mxu3 %v447_v38  ;;  %571 = vmatpush.msra.mxu0 %v546_v39 }
  0xb8   :  { %572 = vmatpush.msra.mxu0 %v545_v40 }
  0xba   :  { %573 = vmatpush.msra.mxu0 %v544_v41 }
  0xbb   :  { %1402 = vmatmul.msk.f32.gmra.mxu0 %vm60_vm0, %v1745_v60  ;;  %1403 = vmatmul.msk.f32.vlgmr.msra.gmra.mxu1 %vm60_vm0, %v1762_v6 }
  0xbc   :  { %1405 = vmatmul.msk.f32.vlgmr.msra.gmra.mxu2 %vm60_vm0, %v1762_v6  ;;  %1407 = vmatmul.msk.f32.vlgmr.msrb.gmra.mxu3 %vm60_vm0, %v1762_v6 }
  0xbd   :  { %574 = vmatpush.msra.mxu0 %v543_v42  ;;  %594 = vmatpush.msra.mxu1 %v550_v43 }
  0xbe   :  { %617 = vmatpush.msra.mxu2 %v554_v44  ;;  %640 = vmatpush.msrb.mxu3 %v558_v45 }
  0xbf   :  { %595 = vmatpush.msra.mxu1 %v549_v46 }
  0xc0   :  { %618 = vmatpush.msra.mxu2 %v553_v47  ;;  %641 = vmatpush.msrb.mxu3 %v557_v48 }
  0xc1   :  { %596 = vmatpush.msra.mxu1 %v548_v49 }
  0xc2   :  { %619 = vmatpush.msra.mxu2 %v552_v50  ;;  %642 = vmatpush.msrb.mxu3 %v556_v51 }
  0xc3   :  { %1404 = vmatmul.msk.f32.gmra.mxu1 %vm60_vm0, %v1745_v60  ;;  %1409 = vmatmul.msk.f32.vlgmr.msrb.gmra.mxu0 %vm60_vm0, %v1762_v6 }
  0xc4   :  { %1406 = vmatmul.msk.f32.gmra.mxu2 %vm60_vm0, %v1745_v60  ;;  %1408 = vmatmul.msk.f32.gmra.mxu3 %vm60_vm0, %v1745_v60 }
  0xc5   :  { %597 = vmatpush.msra.mxu1 %v547_v52  ;;  %620 = vmatpush.msra.mxu2 %v551_v53 }
  0xc6   :  { %643 = vmatpush.msrb.mxu3 %v555_v54 }
  0xcb   :  { %1410 = vmatmul.msk.f32.gmra.mxu0 %vm60_vm0, %v1745_v60  ;;  %1411 = vmatmul.msk.f32.vlgmr.msrb.gmra.mxu1 %vm60_vm0, %v1762_v6 }
  0xcc   :  { %1413 = vmatmul.msk.f32.vlgmr.msrb.gmra.mxu2 %vm60_vm0, %v1762_v6  ;;  %1415 = vmatmul.msk.f32.vlgmr.msra.gmra.mxu3 %vm60_vm0, %v1762_v6 }
  0xd3   :  { %1412 = vmatmul.msk.f32.gmra.mxu1 %vm60_vm0, %v1745_v60  ;;  %1417 = vmatmul.msk.f32.vlgmr.msra.gmra.mxu0 %vm60_vm0, %v1762_v6 }
  0xd4   :  { %1414 = vmatmul.msk.f32.gmra.mxu2 %vm60_vm0, %v1745_v60  ;;  %1416 = vmatmul.msk.f32.gmra.mxu3 %vm60_vm0, %v1745_v60 }
  0xdb   :  { %1418 = vmatmul.msk.f32.gmra.mxu0 %vm60_vm0, %v1745_v60  ;;  %1419 = vmatmul.msk.f32.vlgmr.msra.gmra.mxu1 %vm60_vm0, %v1762_v6 }
  0xdc   :  { %1421 = vmatmul.msk.f32.vlgmr.msra.gmra.mxu2 %vm60_vm0, %v1762_v6  ;;  %1423 = vmatmul.msk.f32.vlgmr.msrb.gmra.mxu3 %vm60_vm0, %v1762_v6 }
  0xe3   :  { %1420 = vmatmul.msk.f32.gmra.mxu1 %vm60_vm0, %v1745_v60 }
  0xe4   :  { %1422 = vmatmul.msk.f32.gmra.mxu2 %vm60_vm0, %v1745_v60  ;;  %1424 = vmatmul.msk.f32.gmra.mxu3 %vm60_vm0, %v1745_v60 }
 0x116   :  { %v1986_v55 = vpop.f32.mrf.mxu3 }
 0x117   :  { %v652_v52 = vmul.f32 %v1986_v55, %v2013_v16 }
 0x118   :  { %v144_v56 = vpop.f32.mrf.mxu0  ;;  %v1988_v57 = vpop.f32.mrf.mxu1 }
 0x119   :  { %v651_v32 = vmul.f32 %v144_v56, %v53_v26  ;;  %v653_v53 = vmul.f32 %v1988_v57, %v53_v26 }
 0x11f   :  { %v1990_v58 = vpop.f32.mrf.mxu2  ;;  %v1992_v59 = vpop.f32.mrf.mxu3 }
 0x120   :  { %v1994_v61 = vpop.f32.mrf.mxu1  ;;  %v252_v62 = vpop.f32.mrf.mxu0 }
 0x121   :  { %v659_v28 = vmul.f32 %v252_v62, %v55_v23 }
 0x123   :  { %v667_v37 = vadd.f32 %v659_v28, %v651_v32 }
 0x127   :  { %v1996_v63 = vpop.f32.mrf.mxu2  ;;  %v1998_v1 = vpop.f32.mrf.mxu3 }
 0x128   :  { %v255_v0 = vpop.f32.mrf.mxu0  ;;  %v275_v3 = vpop.f32.mrf.mxu1 }
 0x129   :  { %v660_v41 = vmul.f32 %v255_v0, %v2018_v17  ;;  %v661_v42 = vmul.f32 %v275_v3, %v55_v23 }
 0x12b   :  { %v668_v3 = vadd.f32 %v660_v41, %v652_v52 }
 0x12f   :  { %v2000_v4 = vpop.f32.mrf.mxu2  ;;  %v2002_v60 = vpop.f32.mrf.mxu3 }
 0x130   :  { %v2004_v5 = vpop.f32.mrf.mxu1  ;;  %v360_v6 = vpop.f32.mrf.mxu0  ;;  %v663_v55 = vmul.f32 %v2000_v4, %v55_v23  ;;  %v665_v57 = vmul.f32 %v2002_v60, %v55_v23  ;;  %v654_v60 = vmul.f32 %v1994_v61, %v2013_v16  ;;  %v656_v61 = vmul.f32 %v1996_v63, %v2013_v16 }
 0x131   :  { %v675_v27 = vmul.f32 %v360_v6, %v53_v26  ;;  %v669_v6 = vadd.f32 %v661_v42, %v653_v53 }
 0x137   :  { %v2006_v7 = vpop.f32.mrf.mxu2  ;;  %v2008_v8 = vpop.f32.mrf.mxu3 }
 0x138   :  { %v363_v2 = vpop.f32.mrf.mxu0  ;;  %v383_v9 = vpop.f32.mrf.mxu1 }
 0x139   :  { %v676_v20 = vmul.f32 %v363_v2, %v2013_v16  ;;  %v677_v40 = vmul.f32 %v383_v9, %v53_v26 }
 0x13f   :  { %v406_v10 = vpop.f32.mrf.mxu2  ;;  %v429_v11 = vpop.f32.mrf.mxu3 }
 0x140   :  { %v386_v12 = vpop.f32.mrf.mxu1  ;;  %v468_v13 = vpop.f32.mrf.mxu0  ;;  %v679_v2 = vmul.f32 %v406_v10, %v53_v26  ;;  %v681_v9 = vmul.f32 %v429_v11, %v53_v26  ;;  %v662_v10 = vmul.f32 %v2004_v5, %v2018_v17  ;;  %v658_v5 = vmul.f32 %v1998_v1, %v2013_v16 }
 0x141   :  { %v683_v24 = vmul.f32 %v468_v13, %v55_v23  ;;  %v678_v35 = vmul.f32 %v386_v12, %v2013_v16 }
 0x143   :  { %v691_v29 = vadd.f32 %v683_v24, %v675_v27 }
 0x147   :  { %v409_v14 = vpop.f32.mrf.mxu2  ;;  %v432_v15 = vpop.f32.mrf.mxu3 }
 0x148   :  { %v471_v18 = vpop.f32.mrf.mxu0  ;;  %v491_v19 = vpop.f32.mrf.mxu1  ;;  %v680_v46 = vmul.f32 %v409_v14, %v2013_v16  ;;  %v682_v47 = vmul.f32 %v432_v15, %v2013_v16  ;;  %v655_v14 = vmul.f32 %v1990_v58, %v53_v26  ;;  %v657_v15 = vmul.f32 %v1992_v59, %v53_v26  ;;  %v700_v16 = vld [vmem:[%s2226_s14 + $0x8] sm:$0xff] }
 0x149   :  { %v684_v21 = vmul.f32 %v471_v18, %v2018_v17  ;;  %v685_v38 = vmul.f32 %v491_v19, %v55_v23  ;;  %v664_v58 = vmul.f32 %v2006_v7, %v2018_v17  ;;  %v666_v59 = vmul.f32 %v2008_v8, %v2018_v17  ;;  %v699_v7 = vld [vmem:[%s2226_s14] sm:$0xff] }
 0x14a   :  { %v671_v19 = vadd.f32 %v663_v55, %v655_v14 }
 0x14b   :  { %v692_v25 = vadd.f32 %v684_v21, %v676_v20  ;;  %v693_v43 = vadd.f32 %v685_v38, %v677_v40  ;;  %v673_v20 = vadd.f32 %v665_v57, %v657_v15  ;;  %v670_v21 = vadd.f32 %v662_v10, %v654_v60 }
 0x14c   :  { %v674_v26 = vadd.f32 %v666_v59, %v658_v5 }
 0x14d   :  { %1425 = vmatpush.xpose.msk.msrb.mxu0 %vm701_vm8, %v692_v25  ;;  %v672_v25 = vadd.f32 %v664_v58, %v656_v61 }
 0x14f   :  { %v514_v30 = vpop.f32.mrf.mxu2  ;;  %v537_v31 = vpop.f32.mrf.mxu3 }
 0x150   :  { %v494_v33 = vpop.f32.mrf.mxu1  ;;  %v576_v34 = vpop.f32.mrf.mxu0  ;;  %v687_v54 = vmul.f32 %v514_v30, %v55_v23  ;;  %v689_v56 = vmul.f32 %v537_v31, %v55_v23 }
 0x151   :  { %v686_v36 = vmul.f32 %v494_v33, %v2018_v17  ;;  %1426 = vmatpush.xpose.msk.msrb.mxu0 %vm701_vm8, %v691_v29 }
 0x152   :  { %v695_v12 = vadd.f32 %v687_v54, %v679_v2  ;;  %v697_v13 = vadd.f32 %v689_v56, %v681_v9 }
 0x153   :  { %v694_v39 = vadd.f32 %v686_v36, %v678_v35 }
 0x154   :  { %1427 = vmatmul.msk.f32.vlgmr.msrb.gmra.mxu0 %vm701_vm8, %v667_v37 }
 0x155   :  { %1429 = vmatpush.xpose.msk.msrb.mxu1 %vm701_vm8, %v694_v39 }
 0x157   :  { %v517_v44 = vpop.f32.mrf.mxu2  ;;  %v540_v45 = vpop.f32.mrf.mxu3 }
 0x158   :  { %v688_v48 = vmul.f32 %v517_v44, %v2018_v17  ;;  %v690_v49 = vmul.f32 %v540_v45, %v2018_v17  ;;  %v579_v50 = vpop.f32.mrf.mxu0  ;;  %v599_v51 = vpop.f32.mrf.mxu1 }
 0x159   :  { %1430 = vmatpush.xpose.msk.msrb.mxu1 %vm701_vm8, %v693_v43  ;;  %951 = vmatpush.msra.mxu0 %v579_v50 }
 0x15a   :  { %v696_v62 = vadd.f32 %v688_v48, %v680_v46  ;;  %v698_v0 = vadd.f32 %v690_v49, %v682_v47 }
 0x15b   :  { %952 = vmatpush.msra.mxu0 %v576_v34 }
 0x15c   :  { %1433 = vmatpush.xpose.msk.msrb.mxu2 %vm701_vm8, %v696_v62  ;;  %1437 = vmatpush.xpose.msk.msra.mxu3 %vm701_vm8, %v698_v0 }
 0x15d   :  { %1428 = vmatmul.msk.f32.gmra.mxu0 %vm701_vm8, %v668_v3  ;;  %1431 = vmatmul.msk.f32.vlgmr.msrb.gmra.mxu1 %vm701_vm8, %v669_v6 }
 0x15f   :  { %v622_v11 = vpop.f32.mrf.mxu2  ;;  %v645_v18 = vpop.f32.mrf.mxu3 }
 0x160   :  { %1434 = vmatpush.xpose.msk.msrb.mxu2 %vm701_vm8, %v695_v12  ;;  %1438 = vmatpush.xpose.msk.msra.mxu3 %vm701_vm8, %v697_v13  ;;  %v602_v4 = vpop.f32.mrf.mxu1 }
 0x161   :  { %980 = vmatpush.msra.mxu1 %v602_v4 }
 0x163   :  { %1435 = vmatmul.msk.f32.vlgmr.msrb.gmra.mxu2 %vm701_vm8, %v671_v19  ;;  %1439 = vmatmul.msk.f32.vlgmr.msra.gmra.mxu3 %vm701_vm8, %v673_v20 }
 0x164   :  { %981 = vmatpush.msra.mxu1 %v599_v51 }
 0x165   :  { %1432 = vmatmul.msk.f32.gmra.mxu1 %vm701_vm8, %v670_v21 }
 0x167   :  { %v625_v23 = vpop.f32.mrf.mxu2  ;;  %v648_v24 = vpop.f32.mrf.mxu3 }
 0x168   :  { %1009 = vmatpush.msra.mxu2 %v625_v23  ;;  %1038 = vmatpush.msrb.mxu3 %v648_v24 }
 0x16a   :  { %1010 = vmatpush.msra.mxu2 %v622_v11  ;;  %1039 = vmatpush.msrb.mxu3 %v645_v18 }
 0x16b   :  { %1436 = vmatmul.msk.f32.gmra.mxu2 %vm701_vm8, %v672_v25  ;;  %1440 = vmatmul.msk.f32.gmra.mxu3 %vm701_vm8, %v674_v26 }
 0x1d1   :  { %v731_v36 = vpop.f32.mrf.mxu0 }
 0x1d2   :  { %v732_v40 = vadd.f32 %v731_v36, %v699_v7 }
 0x1d4   :  { %v843_v43 = vsel %vm842_vm9, %v732_v40, -inf }
 0x1da   :  { %v766_v63 = vpop.f32.mrf.mxu1  ;;  %v734_v44 = vpop.f32.mrf.mxu0 }
 0x1db   :  { %v767_v8 = vadd.f32 %v766_v63, %v699_v7  ;;  %v735_v45 = vadd.f32 %v734_v44, %v700_v16 }
 0x1dd   :  { %v849_v1 = vsel %vm842_vm9, %v767_v8, -inf  ;;  %v846_v46 = vsel %vm842_vm9, %v735_v45, -inf }
 0x1de   :  { %850 = vmax.xlane.f32.xlu0 %v849_v1 }
 0x1e2   :  { %v769_v17 = vpop.f32.mrf.mxu1 }
 0x1e3   :  { %v770_v27 = vadd.f32 %v769_v17, %v700_v16 }
 0x1e5   :  { %v852_v28 = vsel %vm842_vm9, %v770_v27, -inf }
 0x1e6   :  { %v801_v29 = vpop.f32.mrf.mxu2  ;;  %853 = vmax.xlane.f32.xlu0 %v852_v28  ;;  %v836_v31 = vpop.f32.mrf.mxu3 }
 0x1e7   :  { %v802_v30 = vadd.f32 %v801_v29, %v699_v7  ;;  %v837_v33 = vadd.f32 %v836_v31, %v699_v7 }
 0x1e9   :  { %v855_v32 = vsel %vm842_vm9, %v802_v30, -inf  ;;  %v861_v38 = vsel %vm842_vm9, %v837_v33, -inf }
 0x1ea   :  { %856 = vmax.xlane.f32.xlu1 %v855_v32 }
 0x1ee   :  { %v804_v34 = vpop.f32.mrf.mxu2  ;;  %v839_v39 = vpop.f32.mrf.mxu3 }
 0x1ef   :  { %v805_v35 = vadd.f32 %v804_v34, %v700_v16  ;;  %v840_v41 = vadd.f32 %v839_v39, %v700_v16 }
 0x1f1   :  { %v858_v37 = vsel %vm842_vm9, %v805_v35, -inf  ;;  %v864_v42 = vsel %vm842_vm9, %v840_v41, -inf }
 0x1f2   :  { %859 = vmax.xlane.f32.xlu2 %v858_v37  ;;  %862 = vmax.xlane.f32.xlu1 %v861_v38 }
 0x1fa   :  { %865 = vmax.xlane.f32.xlu1 %v864_v42  ;;  %844 = vmax.xlane.f32.xlu2 %v843_v43 }
 0x202   :  { %847 = vmax.xlane.f32.xlu2 %v846_v46 }
 0x251   :  { %v851_v50 = vpop.xlane.xlu0 %850 }
 0x252   :  { %v869_v3 = vsub.f32 %v767_v8, %v851_v50  ;;  %v1047_v50 = vld [vmem:[%s2220_s8] sm:$0xff] }
 0x253   :  { %1072 = vmatpush.msrb.mxu0 %v1047_v50 }
 0x254   :  { %v879_v2 = vmul.f32 1.442695, %v869_v3 }
 0x259   :  { %v854_v57 = vpop.xlane.xlu0 %853 }
 0x25a   :  { %v870_v18 = vsub.f32 %v770_v27, %v854_v57 }
 0x25c   :  { %v881_v19 = vmul.f32 1.442695, %v870_v18 }
 0x25d   :  { %v857_v47 = vpop.xlane.xlu1 %856 }
 0x25e   :  { %v871_v48 = vsub.f32 %v802_v30, %v857_v47 }
 0x260   :  { %v883_v49 = vmul.f32 1.442695, %v871_v48  ;;  %v1049_v48 = vld [vmem:[%s2220_s8 + $0x10] sm:$0xff] }
 0x261   :  { %1130 = vmatpush.msrb.mxu2 %v1049_v48 }
 0x262   :  { %1481 = vpow2.f32 %v883_v49  ;;  %v1050_v49 = vld [vmem:[%s2220_s8 + $0x18] sm:$0xff] }
 0x263   :  { %1159 = vmatpush.msra.mxu3 %v1050_v49  ;;  %v1474_v49 = vld [vmem:[%s2214_s2] ss:$0 sm:$0xff] }
 0x265   :  { %v860_v51 = vpop.xlane.xlu2 %859  ;;  %v863_v52 = vpop.xlane.xlu1 %862 }
 0x266   :  { %v872_v53 = vsub.f32 %v805_v35, %v860_v51  ;;  %v873_v54 = vsub.f32 %v837_v33, %v863_v52  ;;  %v1048_v51 = vld [vmem:[%s2220_s8 + $0x8] sm:$0xff] }
 0x267   :  { %1101 = vmatpush.msrb.mxu1 %v1048_v51 }
 0x268   :  { %v1482_v56 = vpop.eup %1481  ;;  %v885_v62 = vmul.f32 1.442695, %v872_v53  ;;  %v887_v0 = vmul.f32 1.442695, %v873_v54 }
 0x269   :  { %v903_v6 = vsel %vm842_vm9, %v1482_v56, 0.0 }
 0x26a   :  { %1483 = vpow2.f32 %v885_v62  ;;  %904 = vadd.xlane.f32.xlu1 %v903_v6 }
 0x26b   :  { %1485 = vpow2.f32 %v887_v0 }
 0x26c   :  { %1487 = vpow2.f32 %v879_v2 }
 0x26d   :  { %v866_v9 = vpop.xlane.xlu1 %865  ;;  %v845_v55 = vpop.xlane.xlu2 %844 }
 0x26e   :  { %v874_v12 = vsub.f32 %v840_v41, %v866_v9  ;;  %v867_v13 = vsub.f32 %v732_v40, %v845_v55 }
 0x270   :  { %v1484_v14 = vpop.eup %1483  ;;  %v889_v15 = vmul.f32 1.442695, %v874_v12  ;;  %v875_v10 = vmul.f32 1.442695, %v867_v13 }
 0x271   :  { %v1486_v11 = vpop.eup %1485  ;;  %v906_v4 = vsel %vm842_vm9, %v1484_v14, 0.0 }
 0x272   :  { %1489 = vpow2.f32 %v889_v15  ;;  %907 = vadd.xlane.f32.xlu0 %v906_v4  ;;  %v909_v60 = vsel %vm842_vm9, %v1486_v11, 0.0  ;;  %v1488_v58 = vpop.eup %1487 }
 0x273   :  { %1491 = vpow2.f32 %v875_v10  ;;  %910 = vadd.xlane.f32.xlu2 %v909_v60  ;;  %v897_v24 = vsel %vm842_vm9, %v1488_v58, 0.0 }
 0x274   :  { %1493 = vpow2.f32 %v881_v19  ;;  %v1525_v19 = vld [vmem:[%s2212_s0] sm:$0xff] }
 0x275   :  { %v848_v20 = vpop.xlane.xlu2 %847 }
 0x276   :  { %v868_v21 = vsub.f32 %v735_v45, %v848_v20 }
 0x278   :  { %v1490_v59 = vpop.eup %1489  ;;  %v877_v61 = vmul.f32 1.442695, %v868_v21 }
 0x279   :  { %v1492_v5 = vpop.eup %1491  ;;  %v912_v23 = vsel %vm842_vm9, %v1490_v59, 0.0 }
 0x27a   :  { %1495 = vpow2.f32 %v877_v61  ;;  %913 = vadd.xlane.f32.xlu0 %v912_v23  ;;  %v891_v25 = vsel %vm842_vm9, %v1492_v5, 0.0  ;;  %v1494_v26 = vpop.eup %1493 }
 0x27b   :  { %898 = vadd.xlane.f32.xlu2 %v897_v24  ;;  %892 = vadd.xlane.f32.xlu1 %v891_v25  ;;  %v900_v8 = vsel %vm842_vm9, %v1494_v26, 0.0 }
 0x280   :  { %v1496_v7 = vpop.eup %1495 }
 0x281   :  { %v894_v63 = vsel %vm842_vm9, %v1496_v7, 0.0 }
 0x283   :  { %901 = vadd.xlane.f32.xlu2 %v900_v8  ;;  %895 = vadd.xlane.f32.xlu1 %v894_v63  ;;  %v1526_v8 = vld [vmem:[%s2212_s0 + $0x8] sm:$0xff] }
 0x2dd   :  { %v905_v1 = vpop.xlane.xlu1 %904 }
 0x2de   :  { %1497 = vrcp.f32 %v905_v1 }
 0x2e4   :  { %v1498_v16 = vpop.eup %1497 }
 0x2e5   :  { %v927_v17 = vmul.f32 %v1498_v16, %v1482_v56  ;;  %v908_v27 = vpop.xlane.xlu0 %907 }
 0x2e6   :  { %1499 = vrcp.f32 %v908_v27  ;;  %v911_v28 = vpop.xlane.xlu2 %910  ;;  %v1226_v27 = vld [vmem:[%s2221_s9 + $0x18] sm:$0xff] }
 0x2e7   :  { %1501 = vrcp.f32 %v911_v28  ;;  %1445 = vmatmul.msk.f32.vlgmr.msra.gmra.mxu2 %vm842_vm9, %v927_v17  ;;  %v1259_v28 = vld [vmem:[%s2222_s10 + $0x18] sm:$0xff] }
 0x2ec   :  { %v1500_v29 = vpop.eup %1499 }
 0x2ed   :  { %v1502_v30 = vpop.eup %1501  ;;  %v914_v31 = vpop.xlane.xlu0 %913  ;;  %v928_v32 = vmul.f32 %v1500_v29, %v1484_v14  ;;  %v1225_v29 = vld [vmem:[%s2221_s9 + $0x10] sm:$0xff] }
 0x2ee   :  { %v929_v33 = vmul.f32 %v1502_v30, %v1486_v11  ;;  %1503 = vrcp.f32 %v914_v31  ;;  %v893_v34 = vpop.xlane.xlu1 %892  ;;  %v899_v35 = vpop.xlane.xlu2 %898  ;;  %v1258_v30 = vld [vmem:[%s2222_s10 + $0x10] sm:$0xff]  ;;  %v1224_v31 = vld [vmem:[%s2221_s9 + $0x8] sm:$0xff] }
 0x2ef   :  { %1505 = vrcp.f32 %v893_v34  ;;  %1446 = vmatmul.msk.f32.gmra.mxu2 %vm842_vm9, %v928_v32  ;;  %v1257_v32 = vld [vmem:[%s2222_s10 + $0x8] sm:$0xff]  ;;  %v1256_v34 = vld [vmem:[%s2222_s10] sm:$0xff] }
 0x2f0   :  { %1507 = vrcp.f32 %v899_v35  ;;  %1447 = vmatmul.msk.f32.vlgmr.msrb.gmra.mxu3 %vm842_vm9, %v929_v33  ;;  %v1223_v33 = vld [vmem:[%s2221_s9] sm:$0xff] }
 0x2f4   :  { %v1504_v36 = vpop.eup %1503 }
 0x2f5   :  { %v1506_v37 = vpop.eup %1505  ;;  %v930_v38 = vmul.f32 %v1504_v36, %v1490_v59 }
 0x2f6   :  { %v1508_v39 = vpop.eup %1507  ;;  %v923_v40 = vmul.f32 %v1506_v37, %v1492_v5  ;;  %v896_v41 = vpop.xlane.xlu1 %895 }
 0x2f7   :  { %v902_v42 = vpop.xlane.xlu2 %901  ;;  %v925_v43 = vmul.f32 %v1508_v39, %v1488_v58  ;;  %1509 = vrcp.f32 %v896_v41 }
 0x2f8   :  { %1511 = vrcp.f32 %v902_v42  ;;  %1441 = vmatmul.msk.f32.vlgmr.msra.gmra.mxu0 %vm842_vm9, %v923_v40  ;;  %1448 = vmatmul.msk.f32.gmra.mxu3 %vm842_vm9, %v930_v38 }
 0x2f9   :  { %1443 = vmatmul.msk.f32.vlgmr.msra.gmra.mxu1 %vm842_vm9, %v925_v43  ;;  %1245 = vmatpush.msra.mxu0 %v1226_v27 }
 0x2fa   :  { %1272 = vmatpush.msra.mxu1 %v1259_v28 }
 0x2fb   :  { %1246 = vmatpush.msra.mxu0 %v1225_v29 }
 0x2fc   :  { %1273 = vmatpush.msra.mxu1 %v1258_v30 }
 0x2fd   :  { %v1510_v44 = vpop.eup %1509  ;;  %1247 = vmatpush.msra.mxu0 %v1224_v31 }
 0x2fe   :  { %v1512_v45 = vpop.eup %1511  ;;  %v924_v46 = vmul.f32 %v1510_v44, %v1496_v7  ;;  %1274 = vmatpush.msra.mxu1 %v1257_v32 }
 0x2ff   :  { %v926_v47 = vmul.f32 %v1512_v45, %v1494_v26  ;;  %1248 = vmatpush.msra.mxu0 %v1223_v33 }
 0x300   :  { %1442 = vmatmul.msk.f32.gmra.mxu0 %vm842_vm9, %v924_v46  ;;  %1275 = vmatpush.msra.mxu1 %v1256_v34 }
 0x301   :  { %1444 = vmatmul.msk.f32.gmra.mxu1 %vm842_vm9, %v926_v47 }
 0x36a   :  { %v1012_v52 = vpop.f32.mrf.mxu2 }
 0x36b   :  { %1453 = vmatmul.msk.f32.vlgmr.msrb.gmra.mxu2 %vm701_vm8, %v1012_v52 }
 0x372   :  { %v1015_v53 = vpop.f32.mrf.mxu2 }
 0x373   :  { %v1041_v54 = vpop.f32.mrf.mxu3  ;;  %1454 = vmatmul.msk.f32.gmra.mxu2 %vm701_vm8, %v1015_v53 }
 0x374   :  { %1455 = vmatmul.msk.f32.vlgmr.msra.gmra.mxu3 %vm701_vm8, %v1041_v54 }
 0x375   :  { %v954_v56 = vpop.f32.mrf.mxu0 }
 0x376   :  { %v983_v62 = vpop.f32.mrf.mxu1  ;;  %1449 = vmatmul.msk.f32.vlgmr.msrb.gmra.mxu0 %vm701_vm8, %v954_v56 }
 0x377   :  { %1451 = vmatmul.msk.f32.vlgmr.msrb.gmra.mxu1 %vm701_vm8, %v983_v62 }
 0x37b   :  { %v1044_v0 = vpop.f32.mrf.mxu3 }
 0x37c   :  { %1456 = vmatmul.msk.f32.gmra.mxu3 %vm701_vm8, %v1044_v0 }
 0x37d   :  { %v957_v3 = vpop.f32.mrf.mxu0 }
 0x37e   :  { %v986_v6 = vpop.f32.mrf.mxu1  ;;  %1450 = vmatmul.msk.f32.gmra.mxu0 %vm701_vm8, %v957_v3 }
 0x37f   :  { %1452 = vmatmul.msk.f32.gmra.mxu1 %vm701_vm8, %v986_v6  ;;  %v1332_v6 = vld [vmem:[%s2223_s11 + $0x38] sm:$0xff] }
 0x380   :  { %1348 = vmatpush.msra.mxu2 %v1332_v6 }
 0x3ee   :  { %v1132_v2 = vpop.f32.mrf.mxu2 }
 0x3ef   :  { %v1170_v14 = vsel %vm60_vm0, %v1132_v2, 0.0  ;;  %v1331_v2 = vld [vmem:[%s2223_s11 + $0x30] sm:$0xff] }
 0x3f0   :  { %1349 = vmatpush.msra.mxu2 %v1331_v2 }
 0x3f3   :  { %v1074_v9 = vpop.f32.mrf.mxu0 }
 0x3f4   :  { %v1167_v55 = vsel %vm60_vm0, %v1074_v9, 0.0  ;;  %v1103_v57 = vpop.f32.mrf.mxu1  ;;  %v1330_v9 = vld [vmem:[%s2223_s11 + $0x28] sm:$0xff] }
 0x3f5   :  { %v1168_v12 = vsel %vm60_vm0, %v1103_v57, 0.0  ;;  %1350 = vmatpush.msra.mxu2 %v1330_v9  ;;  %v1328_v57 = vld [vmem:[%s2223_s11 + $0x18] sm:$0xff] }
 0x3f6   :  { %v1169_v13 = vadd.f32 %v1168_v12, %v1167_v55  ;;  %v1135_v60 = vpop.f32.mrf.mxu2  ;;  %v1329_v55 = vld [vmem:[%s2223_s11 + $0x20] sm:$0xff]  ;;  %v1327_v12 = vld [vmem:[%s2223_s11 + $0x10] sm:$0xff] }
 0x3f7   :  { %v1161_v15 = vpop.f32.mrf.mxu3  ;;  %v1177_v23 = vsel %vm60_vm0, %v1135_v60, 0.0  ;;  %1351 = vmatpush.msra.mxu2 %v1329_v55 }
 0x3f8   :  { %v1171_v10 = vadd.f32 %v1170_v14, %v1169_v13  ;;  %v1172_v11 = vsel %vm60_vm0, %v1161_v15, 0.0  ;;  %v1326_v13 = vld [vmem:[%s2223_s11 + $0x8] sm:$0xff]  ;;  %v1325_v14 = vld [vmem:[%s2223_s11] sm:$0xff]  ;;  %s1554_s11 = smov [#allocation2]  }
 0x3f9   :  { %1352 = vmatpush.msra.mxu2 %v1328_v57  ;;  %s1371_s0 = sshll.u32 %s1554_s11, 4  ;;  %s1372_s0 = int_to_ptr.vmem [resolvable:$true] %s1371_s0 }
 0x3fa   :  { %v1173_v18 = vadd.f32 %v1172_v11, %v1171_v10 }
 0x3fb   :  { %v1077_v4 = vpop.f32.mrf.mxu0  ;;  %1353 = vmatpush.msra.mxu2 %v1327_v12 }
 0x3fc   :  { %v2127_v20 = vadd.f32 %v1525_v19, %v1173_v18  ;;  %v1174_v21 = vsel %vm60_vm0, %v1077_v4, 0.0  ;;  %v1106_v58 = vpop.f32.mrf.mxu1 }
 0x3fd   :  { %v1175_v59 = vsel %vm60_vm0, %v1106_v58, 0.0  ;;  %1354 = vmatpush.msra.mxu2 %v1326_v13 }
 0x3fe   :  { %v1176_v61 = vadd.f32 %v1175_v59, %v1174_v21  ;;  %v1184_v5 = vmul.f32 %v2127_v20, %v2127_v20 }
 0x3ff   :  { %v1164_v24 = vpop.f32.mrf.mxu3  ;;  %1355 = vmatpush.msra.mxu2 %v1325_v14 }
 0x400   :  { %v1178_v25 = vadd.f32 %v1177_v23, %v1176_v61  ;;  %v1179_v26 = vsel %vm60_vm0, %v1164_v24, 0.0  ;;  %v1186_v7 = vsel %vm60_vm0, %v1184_v5, 0.0 }
 0x401   :  { %1187 = vadd.xlane.f32.xlu0 %v1186_v7 }
 0x402   :  { %v1180_v63 = vadd.f32 %v1179_v26, %v1178_v25 }
 0x404   :  { %v2139_v1 = vadd.f32 %v1526_v8, %v1180_v63 }
 0x406   :  { %v1185_v16 = vmul.f32 %v2139_v1, %v2139_v1 }
 0x408   :  { %v1189_v17 = vsel %vm60_vm0, %v1185_v16, 0.0 }
 0x409   :  { %1190 = vadd.xlane.f32.xlu1 %v1189_v17 }
 0x474   :  { %v1188_v35 = vpop.xlane.xlu0 %1187 }
 0x475   :  { %v1192_v36 = vmul.f32 %v1188_v35, %v1683_v22 }
 0x477   :  { %v1194_v37 = vadd.f32 1e-06, %v1192_v36 }
 0x479   :  { %1513 = vrsqrt.f32 %v1194_v37  ;;  %vm1202_vm11 = vweird.f32 %v1194_v37 }
 0x47c   :  { %v1191_v38 = vpop.xlane.xlu1 %1190 }
 0x47d   :  { %v1193_v39 = vmul.f32 %v1191_v38, %v1683_v22 }
 0x47f   :  { %v1514_v40 = vpop.eup %1513  ;;  %v1195_v41 = vadd.f32 1e-06, %v1193_v39 }
 0x480   :  { %v1197_v42 = vmul.f32 %v1514_v40, %v1194_v37  ;;  %vm1203_vm10 = vweird.f32 %v1514_v40 }
 0x481   :  { %1515 = vrsqrt.f32 %v1195_v41  ;;  %vm1204_vm12 = vmor %vm1202_vm11, %vm1203_vm10  ;;  %vm1212_vm14 = vweird.f32 %v1195_v41 }
 0x482   :  { %v1198_v43 = vmul.f32 %v1514_v40, %v1197_v42 }
 0x484   :  { %v1199_v44 = vmul.f32 0.5, %v1198_v43 }
 0x486   :  { %v1200_v45 = vsub.f32 1.5, %v1199_v44 }
 0x487   :  { %v1516_v46 = vpop.eup %1515 }
 0x488   :  { %v1201_v47 = vmul.f32 %v1514_v40, %v1200_v45  ;;  %v1207_v48 = vmul.f32 %v1516_v46, %v1195_v41  ;;  %vm1213_vm13 = vweird.f32 %v1516_v46 }
 0x489   :  { %vm1214_vm15 = vmor %vm1212_vm14, %vm1213_vm13 }
 0x48a   :  { %v1205_v50 = vsel %vm1204_vm12, %v1514_v40, %v1201_v47  ;;  %v1208_v51 = vmul.f32 %v1516_v46, %v1207_v48 }
 0x48b   :  { %v1216_v22 = vmul.f32 %v1205_v50, %v2127_v20 }
 0x48c   :  { %v1209_v52 = vmul.f32 0.5, %v1208_v51 }
 0x48d   :  { %v1221_v53 = vmul.f32 %v1474_v49, %v1216_v22 }
 0x48e   :  { %v1210_v54 = vsub.f32 1.5, %v1209_v52 }
 0x48f   :  { %1457 = vmatmul.msk.f32.vlgmr.msra.gmra.mxu0 %vm60_vm0, %v1221_v53  ;;  %1459 = vmatmul.msk.f32.vlgmr.msra.gmra.mxu1 %vm60_vm0, %v1221_v53 }
 0x490   :  { %v1211_v56 = vmul.f32 %v1516_v46, %v1210_v54 }
 0x492   :  { %v1215_v62 = vsel %vm1214_vm15, %v1516_v46, %v1211_v56 }
 0x493   :  { %v1217_v0 = vmul.f32 %v1215_v62, %v2139_v1 }
 0x495   :  { %v1222_v3 = vmul.f32 %v1474_v49, %v1217_v0 }
 0x497   :  { %1458 = vmatmul.msk.f32.gmra.mxu0 %vm60_vm0, %v1222_v3  ;;  %1460 = vmatmul.msk.f32.gmra.mxu1 %vm60_vm0, %v1222_v3 }
 0x50c   :  { %v1250_v15 = vpop.f32.mrf.mxu0  ;;  %v1277_v17 = vpop.f32.mrf.mxu1 }
 0x50d   :  { %v1461_v10 = vmul.f32 -1.442695, %v1250_v15 }
 0x50f   :  { %1517 = vpow2.f32 %v1461_v10 }
 0x514   :  { %v1253_v11 = vpop.f32.mrf.mxu0  ;;  %v1280_v38 = vpop.f32.mrf.mxu1 }
 0x515   :  { %v1518_v18 = vpop.eup %1517  ;;  %v1462_v4 = vmul.f32 -1.442695, %v1253_v11 }
 0x516   :  { %v1289_v60 = vadd.f32 1.0, %v1518_v18 }
 0x517   :  { %1519 = vpow2.f32 %v1462_v4 }
 0x518   :  { %1521 = vrcp.f32 %v1289_v60  ;;  %v1302_v5 = vand.u32 2147483648, %v1289_v60  ;;  %v1300_v24 = vand.u32 2147483647, %v1289_v60  ;;  %vm1296_vm2 = vweird.f32 %v1289_v60 }
 0x51a   :  { %v1303_v7 = vor.u32 1.1754944e-38, %v1302_v5  ;;  %vm1301_vm4 = vcmp.eq.f32.partialorder %v1300_v24, 8.507059e+37 }
 0x51d   :  { %v1520_v19 = vpop.eup %1519 }
 0x51e   :  { %v1522_v21 = vpop.eup %1521  ;;  %v1290_v58 = vadd.f32 1.0, %v1520_v19 }
 0x51f   :  { %v1292_v59 = vmul.f32 %v1522_v21, %v1289_v60  ;;  %vm1297_vm1 = vweird.f32 %v1522_v21 }
 0x520   :  { %1523 = vrcp.f32 %v1290_v58  ;;  %vm1298_vm3 = vmor %vm1296_vm2, %vm1297_vm1  ;;  %v1317_v29 = vand.u32 2147483648, %v1290_v58  ;;  %v1315_v32 = vand.u32 2147483647, %v1290_v58  ;;  %vm1311_vm7 = vweird.f32 %v1290_v58 }
 0x521   :  { %v1293_v61 = vsub.f32 1.0, %v1292_v59 }
 0x522   :  { %v1318_v34 = vor.u32 1.1754944e-38, %v1317_v29  ;;  %vm1316_vm9 = vcmp.eq.f32.partialorder %v1315_v32, 8.507059e+37 }
 0x523   :  { %v1294_v23 = vmul.f32 %v1522_v21, %v1293_v61 }
 0x525   :  { %v1295_v25 = vadd.f32 %v1522_v21, %v1294_v23 }
 0x526   :  { %v1524_v26 = vpop.eup %1523 }
 0x527   :  { %v1299_v63 = vsel %vm1298_vm3, %v1522_v21, %v1295_v25  ;;  %v1307_v8 = vmul.f32 %v1524_v26, %v1290_v58  ;;  %vm1312_vm6 = vweird.f32 %v1524_v26 }
 0x528   :  { %v1304_v16 = vsel %vm1301_vm4, %v1303_v7, %v1299_v63  ;;  %vm1313_vm8 = vmor %vm1311_vm7, %vm1312_vm6 }
 0x529   :  { %v1321_v27 = vmul.f32 %v1304_v16, %v1250_v15  ;;  %v1308_v28 = vsub.f32 1.0, %v1307_v8 }
 0x52b   :  { %v1323_v30 = vmul.f32 %v1321_v27, %v1277_v17  ;;  %v1309_v31 = vmul.f32 %v1524_v26, %v1308_v28 }
 0x52d   :  { %v1310_v33 = vadd.f32 %v1524_v26, %v1309_v31  ;;  %1463 = vmatmul.msk.f32.vlgmr.msra.gmra.mxu2 %vm1333_vm5, %v1323_v30 }
 0x52f   :  { %v1314_v35 = vsel %vm1313_vm8, %v1524_v26, %v1310_v33 }
 0x530   :  { %v1319_v36 = vsel %vm1316_vm9, %v1318_v34, %v1314_v35 }
 0x531   :  { %v1322_v37 = vmul.f32 %v1319_v36, %v1253_v11 }
 0x533   :  { %v1324_v39 = vmul.f32 %v1322_v37, %v1280_v38 }
 0x535   :  { %1464 = vmatmul.msk.f32.gmra.mxu2 %vm1333_vm5, %v1324_v39 }
 0x5b0   :  { %v1357_v40 = vpop.f32.mrf.mxu2 }
 0x5b1   :  { %v1363_v41 = vadd.f32 %v1357_v40, %v2127_v20 }
 0x5b3   :  { %1365 = vst.msk [vmem:[#allocation2] sm:$0xff] %vm60_vm0, %v1363_v41 }
 0x5b8   :  { %v1360_v42 = vpop.f32.mrf.mxu2 }
 0x5b9   :  { %v1364_v43 = vadd.f32 %v1360_v42, %v2139_v1 }
 0x5bb   :  { %1366 = vst.msk [vmem:[#allocation2 + $0x8] sm:$0xff] %vm60_vm0, %v1364_v43 }
 0x5bc   :  { %1379 = dma.vmem_to_hbm [thread:$0]  %s1372_s0, 256, %s1374_s4, [#allocation3], %s1555_s3, %s1555_s3, %s1556_s12  }
 0x5bd   :  { %1551 = dma.done.wait [#allocation3], 256  }
 0x5be   :  { %1552 = vsyncadd [#allocation3], 4294967040 }
 0x5bf   :  { %1384 = vsyncpa [#allocation3], 1 }

</bundles_post_ra>
